<compile_context>
chip_gen: v7x
topology: tpu7x:2x2x1
jax: 0.10.0
libtpu: 0.0.40
codegen_flags: <defaults>
</compile_context>

<pallas_src>
import functools

import jax
import jax.numpy as jnp
from jax.experimental import pallas as pl
from jax.experimental.pallas import tpu as pltpu


# ------------------------- Pallas kernels -------------------------


def _conv1_kernel(xe0_ref, xe1_ref, xe2_ref, xo0_ref, xo1_ref, xo2_ref,
                  w_ref, b_ref, o_ref, *, neg_slope):
    """3x3 stride-2 conv + bias + LeakyReLU for one (image, output-row) pair.

    Inputs are the three padded input rows 2j, 2j+1, 2j+2, pre-split by column
    parity (even/odd), laid out (Cin, W_half) with W on lanes.  Output block is
    (Cout, Wo), lane-dense along W.
    """
    wo = o_ref.shape[1]
    acc = jnp.zeros(o_ref.shape, jnp.float32)
    even = (xe0_ref, xe1_ref, xe2_ref)
    odd = (xo0_ref, xo1_ref, xo2_ref)
    for kh in range(3):
        xe = even[kh][...]                                  # (Cin, Wo + 1)
        xo = odd[kh][...]                                   # (Cin, >= Wo)
        taps = (xe[:, 0:wo], xo[:, 0:wo], xe[:, 1:wo + 1])  # kw = 0, 1, 2
        for kw in range(3):
            acc = acc + jnp.dot(w_ref[3 * kh + kw], taps[kw],
                                preferred_element_type=jnp.float32)
    acc = acc + b_ref[...]                                  # (Cout,1) broadcast over lanes
    o_ref[...] = jnp.where(acc >= 0.0, acc, acc * neg_slope)


def _fused_tail_kernel(xskip_ref, y0_ref, y1_ref, y2_ref,
                       w2_ref, b2_ref, ws_ref, bs_ref, g_ref, beta_ref,
                       o_ref, *, ho):
    """conv2 (3x3, stride 1) + 1x1 stride-2 skip conv + GDN + residual add.

    y{0,1,2}_ref are out1 rows j-1, j, j+1 (index maps clamp; out-of-range rows are
    zero-masked here).  Width halo is handled by zero-padding along the lane dim.
    """
    cout, wo = o_ref.shape
    j = pl.program_id(1)

    # conv2: accumulate the 9 taps.
    acc = jnp.zeros((cout, wo), jnp.float32)
    zcol = jnp.zeros((cout, 1), jnp.float32)
    rows = (y0_ref, y1_ref, y2_ref)
    for kh in range(3):
        src = j + (kh - 1)
        valid = jnp.logical_and(src >= 0, src < ho).astype(jnp.float32)
        v = rows[kh][...] * valid                                 # (Cout, Wo)
        vpad = jnp.concatenate([zcol, v, zcol], axis=-1)          # (Cout, Wo + 2)
        for kw in range(3):
            acc = acc + jnp.dot(w2_ref[3 * kh + kw], vpad[:, kw:kw + wo],
                                preferred_element_type=jnp.float32)
    y = acc + b2_ref[...]                                         # conv2 output

    # 1x1 stride-2 skip conv on the original input.
    identity = jnp.dot(ws_ref[...], xskip_ref[...][:, 0:wo],
                       preferred_element_type=jnp.float32) + bs_ref[...]

    # GDN: y * rsqrt(beta + gamma @ y^2), then residual add (rsqrt -> EUP slot).
    norm = jnp.dot(g_ref[...], y * y,
                   preferred_element_type=jnp.float32) + beta_ref[...]
    o_ref[...] = y * jax.lax.rsqrt(norm) + identity


# ------------------------- wrapper -------------------------


def prepare_params(params):
    """Pack weights once, outside the traced forward.

    Weights become tap-major (9, Cout, Cin) so each (kh, kw) tap is a ready-to-use
    (Cout, Cin) matmul operand; biases/beta become (Cout, 1) columns that broadcast
    along the lane (W) dimension.
    """
    w1 = params["w1"]
    cout, cin = int(w1.shape[0]), int(w1.shape[1])
    return {
        "w1": jnp.transpose(w1, (2, 3, 0, 1)).reshape(9, cout, cin),
        "b1": params["b1"].reshape(cout, 1),
        "w2": jnp.transpose(params["w2"], (2, 3, 0, 1)).reshape(9, cout, cout),
        "b2": params["b2"].reshape(cout, 1),
        "ws": params["ws"].reshape(cout, cin),
        "bs": params["bs"].reshape(cout, 1),
        "gamma": params["gamma"],
        "beta": params["beta"].reshape(cout, 1),
    }


def residual_block_with_stride_m(x_nchw, mask1, mask2, packed, stride=2):
    # Masks are unused: the mask logic in CustomConv2DPyMV3.forward is commented out
    # in the reference, so each conv reduces to Conv2d + bias.
    del mask1, mask2
    if stride != 2:
        raise NotImplementedError("kernel is specialized for stride=2")

    n, cin, h, w = x_nchw.shape
    cout = packed["w1"].shape[1]
    ho = (h - 1) // 2 + 1
    wo = (w - 1) // 2 + 1

    x = x_nchw.astype(jnp.float32)
    # NCHW -> NHCW (W stays on lanes, C on sublanes), pad H/W by 1, split W by parity
    # so the stride-2 width taps become static contiguous lane slices.
    xp = jnp.pad(jnp.transpose(x, (0, 2, 1, 3)), ((0, 0), (1, 1), (0, 0), (1, 1)))
    xpe = xp[:, :, :, 0::2]            # (N, H+2, Cin, We)   even padded columns
    xpo = xp[:, :, :, 1::2]            # (N, H+2, Cin, Wod)  odd padded columns
    we, wod = xpe.shape[-1], xpo.shape[-1]

    cparams = pltpu.CompilerParams(
        dimension_semantics=("parallel", "parallel"),
        vmem_limit_bytes=32 * 1024 * 1024,
    )

    def full_spec(shape):
        return pl.BlockSpec(shape, lambda i, j: (0,) * len(shape))

    # ---- kernel 1: conv1 (3x3, stride 2) + bias + LeakyReLU -> out1 (N, Ho, Cout, Wo)
    def x_row_spec(width, r):
        return pl.BlockSpec((None, None, cin, width),
                            lambda i, j, r=r: (i, 2 * j + r, 0, 0))

    out1 = pl.pallas_call(
        functools.partial(_conv1_kernel, neg_slope=0.01),
        out_shape=jax.ShapeDtypeStruct((n, ho, cout, wo), jnp.float32),
        grid=(n, ho),
        in_specs=[
            x_row_spec(we, 0), x_row_spec(we, 1), x_row_spec(we, 2),
            x_row_spec(wod, 0), x_row_spec(wod, 1), x_row_spec(wod, 2),
            full_spec((9, cout, cin)), full_spec((cout, 1)),
        ],
        out_specs=pl.BlockSpec((None, None, cout, wo), lambda i, j: (i, j, 0, 0)),
        compiler_params=cparams,
    )(xpe, xpe, xpe, xpo, xpo, xpo, packed["w1"], packed["b1"])

    # ---- kernel 2: conv2 (3x3) + 1x1 skip + GDN + residual -> (N, Ho, Cout, Wo)
    def y_row_spec(r):
        return pl.BlockSpec(
            (None, None, cout, wo),
            lambda i, j, r=r: (i, jnp.clip(j - 1 + r, 0, ho - 1), 0, 0))

    skip_spec = pl.BlockSpec((None, None, cin, wod),
                             lambda i, j: (i, 2 * j + 1, 0, 0))

    out = pl.pallas_call(
        functools.partial(_fused_tail_kernel, ho=ho),
        out_shape=jax.ShapeDtypeStruct((n, ho, cout, wo), jnp.float32),
        grid=(n, ho),
        in_specs=[
            skip_spec, y_row_spec(0), y_row_spec(1), y_row_spec(2),
            full_spec((9, cout, cout)), full_spec((cout, 1)),
            full_spec((cout, cin)), full_spec((cout, 1)),
            full_spec((cout, cout)), full_spec((cout, 1)),
        ],
        out_specs=pl.BlockSpec((None, None, cout, wo), lambda i, j: (i, j, 0, 0)),
        compiler_params=cparams,
    )(xpo, out1, out1, out1,
      packed["w2"], packed["b2"], packed["ws"], packed["bs"],
      packed["gamma"], packed["beta"])

    # NHCW -> NCHW for the final result (matches the PyTorch module output layout).
    return jnp.transpose(out, (0, 2, 1, 3))


# ------------------------- pure-JAX reference -------------------------


def _ref_conv(x_nchw, w, b, stride, pad):
    out = jax.lax.conv_general_dilated(
        x_nchw, w, (stride, stride), [(pad, pad), (pad, pad)],
        dimension_numbers=("NCHW", "OIHW", "NCHW"))
    return out + b[None, :, None, None]


def reference(x_nchw, params, stride=2):
    out = _ref_conv(x_nchw, params["w1"], params["b1"], stride, 1)
    out = jnp.where(out >= 0.0, out, 0.01 * out)
    out = _ref_conv(out, params["w2"], params["b2"], 1, 1)
    c = out.shape[1]
    norm = _ref_conv(out * out, params["gamma"].reshape(c, c, 1, 1), params["beta"], 1, 0)
    out = out / jnp.sqrt(norm)
    identity = _ref_conv(x_nchw, params["ws"], params["bs"], stride, 0)
    return out + identity


# ------------------------- main -------------------------

if __name__ == "__main__":
    N, in_ch, out_ch, H, W, stride = 2, 4, 8, 16, 16, 2

    key = jax.random.PRNGKey(0)
    k1, k2, k3, k4, k5, k6, kx = jax.random.split(key, 7)
    params = {
        "w1": 0.1 * jax.random.normal(k1, (out_ch, in_ch, 3, 3), jnp.float32),
        "b1": 0.1 * jax.random.normal(k2, (out_ch,), jnp.float32),
        "w2": 0.1 * jax.random.normal(k3, (out_ch, out_ch, 3, 3), jnp.float32),
        "b2": 0.1 * jax.random.normal(k4, (out_ch,), jnp.float32),
        "ws": 0.1 * jax.random.normal(k5, (out_ch, in_ch, 1, 1), jnp.float32),
        "bs": 0.1 * jax.random.normal(k6, (out_ch,), jnp.float32),
        # GDN parameters (deterministic, positive): beta=1, gamma ~ 0.1*I + small positive
        "beta": jnp.ones((out_ch,), jnp.float32),
        "gamma": 0.1 * jnp.eye(out_ch, dtype=jnp.float32) + 0.001,
    }
    packed = prepare_params(params)   # one-time weight packing, hoisted out of the jit

    x = jax.random.normal(kx, (N, in_ch, H, W), jnp.float32)
    mask1 = jnp.ones((N, 1, H, W), jnp.float32)                      # unused (see note)
    mask2 = jnp.ones((N, 1, H // stride, W // stride), jnp.float32)  # unused

    fwd = jax.jit(functools.partial(residual_block_with_stride_m, stride=stride))
    out = jax.block_until_ready(fwd(x, mask1, mask2, packed))

    ref = reference(x, params, stride=stride)
    assert out.shape == (N, out_ch, H // stride, W // stride), out.shape
    err = float(jnp.max(jnp.abs(out - ref)))
    assert jnp.allclose(out, ref, rtol=1e-4, atol=1e-4), err

    print("KERNEL_OK")
</pallas_src>

<mosaic_0001>
module attributes {stable_mosaic.version = 11 : i64} {
  func.func @_conv1_kernel(%arg0: i32, %arg1: i32, %arg2: memref<1x1x4x9xf32, #tpu.memory_space<vmem>>, %arg3: memref<1x1x4x9xf32, #tpu.memory_space<vmem>>, %arg4: memref<1x1x4x9xf32, #tpu.memory_space<vmem>>, %arg5: memref<1x1x4x9xf32, #tpu.memory_space<vmem>>, %arg6: memref<1x1x4x9xf32, #tpu.memory_space<vmem>>, %arg7: memref<1x1x4x9xf32, #tpu.memory_space<vmem>>, %arg8: memref<9x8x4xf32, #tpu.memory_space<vmem>>, %arg9: memref<8x1xf32, #tpu.memory_space<vmem>>, %arg10: memref<1x1x8x8xf32, #tpu.memory_space<vmem>>) attributes {dimension_semantics = [#tpu.dimension_semantics<parallel>, #tpu.dimension_semantics<parallel>], iteration_bounds = array<i64: 2, 8>, scalar_prefetch = 0 : i64, scratch_operands = 0 : i64, tpu.core_type = #tpu.core_type<tc>, window_params = [{transform_indices = @transform_0, window_bounds = array<i64: 1, 1, 4, 9>}, {transform_indices = @transform_1, window_bounds = array<i64: 1, 1, 4, 9>}, {transform_indices = @transform_2, window_bounds = array<i64: 1, 1, 4, 9>}, {transform_indices = @transform_3, window_bounds = array<i64: 1, 1, 4, 9>}, {transform_indices = @transform_4, window_bounds = array<i64: 1, 1, 4, 9>}, {transform_indices = @transform_5, window_bounds = array<i64: 1, 1, 4, 9>}, {pipeline_mode = #tpu.pipeline_mode<synchronous>, transform_indices = @transform_6, window_bounds = array<i64: 9, 8, 4>}, {pipeline_mode = #tpu.pipeline_mode<synchronous>, transform_indices = @transform_7, window_bounds = array<i64: 8, 1>}, {transform_indices = @transform_8, window_bounds = array<i64: 1, 1, 8, 8>}]} {
    %cst = arith.constant 0.000000e+00 : f32
    %0 = vector.broadcast %cst : f32 to vector<8x8xf32>
    %c0 = arith.constant 0 : index
    %c0_0 = arith.constant 0 : index
    %c0_1 = arith.constant 0 : index
    %c0_2 = arith.constant 0 : index
    %1 = vector.load %arg2[%c0, %c0_0, %c0_1, %c0_2] : memref<1x1x4x9xf32, #tpu.memory_space<vmem>>, vector<1x1x4x9xf32>
    %2 = vector.shape_cast %1 : vector<1x1x4x9xf32> to vector<4x9xf32>
    %c0_3 = arith.constant 0 : index
    %c0_4 = arith.constant 0 : index
    %c0_5 = arith.constant 0 : index
    %c0_6 = arith.constant 0 : index
    %3 = vector.load %arg5[%c0_3, %c0_4, %c0_5, %c0_6] : memref<1x1x4x9xf32, #tpu.memory_space<vmem>>, vector<1x1x4x9xf32>
    %4 = vector.shape_cast %3 : vector<1x1x4x9xf32> to vector<4x9xf32>
    %5 = vector.extract_strided_slice %2 {offsets = [0, 0], sizes = [4, 8], strides = [1, 1]} : vector<4x9xf32> to vector<4x8xf32>
    %6 = vector.extract_strided_slice %4 {offsets = [0, 0], sizes = [4, 8], strides = [1, 1]} : vector<4x9xf32> to vector<4x8xf32>
    %7 = vector.extract_strided_slice %2 {offsets = [0, 1], sizes = [4, 8], strides = [1, 1]} : vector<4x9xf32> to vector<4x8xf32>
    %c0_7 = arith.constant 0 : index
    %c0_8 = arith.constant 0 : index
    %c0_9 = arith.constant 0 : index
    %8 = vector.load %arg8[%c0_7, %c0_8, %c0_9] : memref<9x8x4xf32, #tpu.memory_space<vmem>>, vector<1x8x4xf32>
    %9 = vector.shape_cast %8 : vector<1x8x4xf32> to vector<8x4xf32>
    %cst_10 = arith.constant dense<0.000000e+00> : vector<8x8xf32>
    %10 = tpu.matmul %9, %5, %cst_10 {dimension_numbers = #tpu.dot_dimension_numbers<[1], [0], [0], [1], [0, 0, 1, 1], [], []>} : vector<8x4xf32>, vector<4x8xf32>, vector<8x8xf32> -> vector<8x8xf32>
    %11 = arith.addf %0, %10 : vector<8x8xf32>
    %c1 = arith.constant 1 : index
    %c0_11 = arith.constant 0 : index
    %c0_12 = arith.constant 0 : index
    %12 = vector.load %arg8[%c1, %c0_11, %c0_12] : memref<9x8x4xf32, #tpu.memory_space<vmem>>, vector<1x8x4xf32>
    %13 = vector.shape_cast %12 : vector<1x8x4xf32> to vector<8x4xf32>
    %cst_13 = arith.constant dense<0.000000e+00> : vector<8x8xf32>
    %14 = tpu.matmul %13, %6, %cst_13 {dimension_numbers = #tpu.dot_dimension_numbers<[1], [0], [0], [1], [0, 0, 1, 1], [], []>} : vector<8x4xf32>, vector<4x8xf32>, vector<8x8xf32> -> vector<8x8xf32>
    %15 = arith.addf %11, %14 : vector<8x8xf32>
    %c2 = arith.constant 2 : index
    %c0_14 = arith.constant 0 : index
    %c0_15 = arith.constant 0 : index
    %16 = vector.load %arg8[%c2, %c0_14, %c0_15] : memref<9x8x4xf32, #tpu.memory_space<vmem>>, vector<1x8x4xf32>
    %17 = vector.shape_cast %16 : vector<1x8x4xf32> to vector<8x4xf32>
    %cst_16 = arith.constant dense<0.000000e+00> : vector<8x8xf32>
    %18 = tpu.matmul %17, %7, %cst_16 {dimension_numbers = #tpu.dot_dimension_numbers<[1], [0], [0], [1], [0, 0, 1, 1], [], []>} : vector<8x4xf32>, vector<4x8xf32>, vector<8x8xf32> -> vector<8x8xf32>
    %19 = arith.addf %15, %18 : vector<8x8xf32>
    %c0_17 = arith.constant 0 : index
    %c0_18 = arith.constant 0 : index
    %c0_19 = arith.constant 0 : index
    %c0_20 = arith.constant 0 : index
    %20 = vector.load %arg3[%c0_17, %c0_18, %c0_19, %c0_20] : memref<1x1x4x9xf32, #tpu.memory_space<vmem>>, vector<1x1x4x9xf32>
    %21 = vector.shape_cast %20 : vector<1x1x4x9xf32> to vector<4x9xf32>
    %c0_21 = arith.constant 0 : index
    %c0_22 = arith.constant 0 : index
    %c0_23 = arith.constant 0 : index
    %c0_24 = arith.constant 0 : index
    %22 = vector.load %arg6[%c0_21, %c0_22, %c0_23, %c0_24] : memref<1x1x4x9xf32, #tpu.memory_space<vmem>>, vector<1x1x4x9xf32>
    %23 = vector.shape_cast %22 : vector<1x1x4x9xf32> to vector<4x9xf32>
    %24 = vector.extract_strided_slice %21 {offsets = [0, 0], sizes = [4, 8], strides = [1, 1]} : vector<4x9xf32> to vector<4x8xf32>
    %25 = vector.extract_strided_slice %23 {offsets = [0, 0], sizes = [4, 8], strides = [1, 1]} : vector<4x9xf32> to vector<4x8xf32>
    %26 = vector.extract_strided_slice %21 {offsets = [0, 1], sizes = [4, 8], strides = [1, 1]} : vector<4x9xf32> to vector<4x8xf32>
    %c3 = arith.constant 3 : index
    %c0_25 = arith.constant 0 : index
    %c0_26 = arith.constant 0 : index
    %27 = vector.load %arg8[%c3, %c0_25, %c0_26] : memref<9x8x4xf32, #tpu.memory_space<vmem>>, vector<1x8x4xf32>
    %28 = vector.shape_cast %27 : vector<1x8x4xf32> to vector<8x4xf32>
    %cst_27 = arith.constant dense<0.000000e+00> : vector<8x8xf32>
    %29 = tpu.matmul %28, %24, %cst_27 {dimension_numbers = #tpu.dot_dimension_numbers<[1], [0], [0], [1], [0, 0, 1, 1], [], []>} : vector<8x4xf32>, vector<4x8xf32>, vector<8x8xf32> -> vector<8x8xf32>
    %30 = arith.addf %19, %29 : vector<8x8xf32>
    %c4 = arith.constant 4 : index
    %c0_28 = arith.constant 0 : index
    %c0_29 = arith.constant 0 : index
    %31 = vector.load %arg8[%c4, %c0_28, %c0_29] : memref<9x8x4xf32, #tpu.memory_space<vmem>>, vector<1x8x4xf32>
    %32 = vector.shape_cast %31 : vector<1x8x4xf32> to vector<8x4xf32>
    %cst_30 = arith.constant dense<0.000000e+00> : vector<8x8xf32>
    %33 = tpu.matmul %32, %25, %cst_30 {dimension_numbers = #tpu.dot_dimension_numbers<[1], [0], [0], [1], [0, 0, 1, 1], [], []>} : vector<8x4xf32>, vector<4x8xf32>, vector<8x8xf32> -> vector<8x8xf32>
    %34 = arith.addf %30, %33 : vector<8x8xf32>
    %c5 = arith.constant 5 : index
    %c0_31 = arith.constant 0 : index
    %c0_32 = arith.constant 0 : index
    %35 = vector.load %arg8[%c5, %c0_31, %c0_32] : memref<9x8x4xf32, #tpu.memory_space<vmem>>, vector<1x8x4xf32>
    %36 = vector.shape_cast %35 : vector<1x8x4xf32> to vector<8x4xf32>
    %cst_33 = arith.constant dense<0.000000e+00> : vector<8x8xf32>
    %37 = tpu.matmul %36, %26, %cst_33 {dimension_numbers = #tpu.dot_dimension_numbers<[1], [0], [0], [1], [0, 0, 1, 1], [], []>} : vector<8x4xf32>, vector<4x8xf32>, vector<8x8xf32> -> vector<8x8xf32>
    %38 = arith.addf %34, %37 : vector<8x8xf32>
    %c0_34 = arith.constant 0 : index
    %c0_35 = arith.constant 0 : index
    %c0_36 = arith.constant 0 : index
    %c0_37 = arith.constant 0 : index
    %39 = vector.load %arg4[%c0_34, %c0_35, %c0_36, %c0_37] : memref<1x1x4x9xf32, #tpu.memory_space<vmem>>, vector<1x1x4x9xf32>
    %40 = vector.shape_cast %39 : vector<1x1x4x9xf32> to vector<4x9xf32>
    %c0_38 = arith.constant 0 : index
    %c0_39 = arith.constant 0 : index
    %c0_40 = arith.constant 0 : index
    %c0_41 = arith.constant 0 : index
    %41 = vector.load %arg7[%c0_38, %c0_39, %c0_40, %c0_41] : memref<1x1x4x9xf32, #tpu.memory_space<vmem>>, vector<1x1x4x9xf32>
    %42 = vector.shape_cast %41 : vector<1x1x4x9xf32> to vector<4x9xf32>
    %43 = vector.extract_strided_slice %40 {offsets = [0, 0], sizes = [4, 8], strides = [1, 1]} : vector<4x9xf32> to vector<4x8xf32>
    %44 = vector.extract_strided_slice %42 {offsets = [0, 0], sizes = [4, 8], strides = [1, 1]} : vector<4x9xf32> to vector<4x8xf32>
    %45 = vector.extract_strided_slice %40 {offsets = [0, 1], sizes = [4, 8], strides = [1, 1]} : vector<4x9xf32> to vector<4x8xf32>
    %c6 = arith.constant 6 : index
    %c0_42 = arith.constant 0 : index
    %c0_43 = arith.constant 0 : index
    %46 = vector.load %arg8[%c6, %c0_42, %c0_43] : memref<9x8x4xf32, #tpu.memory_space<vmem>>, vector<1x8x4xf32>
    %47 = vector.shape_cast %46 : vector<1x8x4xf32> to vector<8x4xf32>
    %cst_44 = arith.constant dense<0.000000e+00> : vector<8x8xf32>
    %48 = tpu.matmul %47, %43, %cst_44 {dimension_numbers = #tpu.dot_dimension_numbers<[1], [0], [0], [1], [0, 0, 1, 1], [], []>} : vector<8x4xf32>, vector<4x8xf32>, vector<8x8xf32> -> vector<8x8xf32>
    %49 = arith.addf %38, %48 : vector<8x8xf32>
    %c7 = arith.constant 7 : index
    %c0_45 = arith.constant 0 : index
    %c0_46 = arith.constant 0 : index
    %50 = vector.load %arg8[%c7, %c0_45, %c0_46] : memref<9x8x4xf32, #tpu.memory_space<vmem>>, vector<1x8x4xf32>
    %51 = vector.shape_cast %50 : vector<1x8x4xf32> to vector<8x4xf32>
    %cst_47 = arith.constant dense<0.000000e+00> : vector<8x8xf32>
    %52 = tpu.matmul %51, %44, %cst_47 {dimension_numbers = #tpu.dot_dimension_numbers<[1], [0], [0], [1], [0, 0, 1, 1], [], []>} : vector<8x4xf32>, vector<4x8xf32>, vector<8x8xf32> -> vector<8x8xf32>
    %53 = arith.addf %49, %52 : vector<8x8xf32>
    %c8 = arith.constant 8 : index
    %c0_48 = arith.constant 0 : index
    %c0_49 = arith.constant 0 : index
    %54 = vector.load %arg8[%c8, %c0_48, %c0_49] : memref<9x8x4xf32, #tpu.memory_space<vmem>>, vector<1x8x4xf32>
    %55 = vector.shape_cast %54 : vector<1x8x4xf32> to vector<8x4xf32>
    %cst_50 = arith.constant dense<0.000000e+00> : vector<8x8xf32>
    %56 = tpu.matmul %55, %45, %cst_50 {dimension_numbers = #tpu.dot_dimension_numbers<[1], [0], [0], [1], [0, 0, 1, 1], [], []>} : vector<8x4xf32>, vector<4x8xf32>, vector<8x8xf32> -> vector<8x8xf32>
    %57 = arith.addf %53, %56 : vector<8x8xf32>
    %c0_51 = arith.constant 0 : index
    %c0_52 = arith.constant 0 : index
    %58 = vector.load %arg9[%c0_51, %c0_52] : memref<8x1xf32, #tpu.memory_space<vmem>>, vector<8x1xf32>
    %59 = vector.broadcast %58 : vector<8x1xf32> to vector<8x8xf32>
    %60 = arith.addf %57, %59 : vector<8x8xf32>
    %cst_53 = arith.constant 0.000000e+00 : f32
    %61 = vector.broadcast %cst_53 : f32 to vector<8x8xf32>
    %62 = arith.cmpf oge, %60, %61 : vector<8x8xf32>
    %cst_54 = arith.constant 0.00999999977 : f32
    %63 = vector.broadcast %cst_54 : f32 to vector<8x8xf32>
    %64 = arith.mulf %60, %63 : vector<8x8xf32>
    %65 = arith.select %62, %60, %64 : vector<8x8xi1>, vector<8x8xf32>
    %c0_55 = arith.constant 0 : index
    %c0_56 = arith.constant 0 : index
    %c0_57 = arith.constant 0 : index
    %c0_58 = arith.constant 0 : index
    %66 = vector.load %arg10[%c0_55, %c0_56, %c0_57, %c0_58] : memref<1x1x8x8xf32, #tpu.memory_space<vmem>>, vector<1x1x8x8xf32>
    %67 = vector.shape_cast %66 : vector<1x1x8x8xf32> to vector<8x8xf32>
    %68 = vector.shape_cast %65 : vector<8x8xf32> to vector<1x1x8x8xf32>
    tpu.vector_store %arg10[%c0_55, %c0_56, %c0_57, %c0_58], %68 {strides = array<i32>} : memref<1x1x8x8xf32, #tpu.memory_space<vmem>>, vector<1x1x8x8xf32>,
    return
  }
  func.func @transform_0(%arg0: i32, %arg1: i32) -> (i32, i32, i32, i32) {
    %c2_i32 = arith.constant 2 : i32
    %0 = arith.muli %c2_i32, %arg1 : i32
    %c0_i32 = arith.constant 0 : i32
    %1 = arith.addi %0, %c0_i32 : i32
    %c0_i32_0 = arith.constant 0 : i32
    %c0_i32_1 = arith.constant 0 : i32
    %c0_i32_2 = arith.constant 0 : i32
    return %arg0, %1, %c0_i32_0, %c0_i32_1 : i32, i32, i32, i32
  }
  func.func @transform_1(%arg0: i32, %arg1: i32) -> (i32, i32, i32, i32) {
    %c2_i32 = arith.constant 2 : i32
    %0 = arith.muli %c2_i32, %arg1 : i32
    %c1_i32 = arith.constant 1 : i32
    %1 = arith.addi %0, %c1_i32 : i32
    %c0_i32 = arith.constant 0 : i32
    %c0_i32_0 = arith.constant 0 : i32
    %c0_i32_1 = arith.constant 0 : i32
    return %arg0, %1, %c0_i32, %c0_i32_0 : i32, i32, i32, i32
  }
  func.func @transform_2(%arg0: i32, %arg1: i32) -> (i32, i32, i32, i32) {
    %c2_i32 = arith.constant 2 : i32
    %0 = arith.muli %c2_i32, %arg1 : i32
    %c2_i32_0 = arith.constant 2 : i32
    %1 = arith.addi %0, %c2_i32_0 : i32
    %c0_i32 = arith.constant 0 : i32
    %c0_i32_1 = arith.constant 0 : i32
    %c0_i32_2 = arith.constant 0 : i32
    return %arg0, %1, %c0_i32, %c0_i32_1 : i32, i32, i32, i32
  }
  func.func @transform_3(%arg0: i32, %arg1: i32) -> (i32, i32, i32, i32) {
    %c2_i32 = arith.constant 2 : i32
    %0 = arith.muli %c2_i32, %arg1 : i32
    %c0_i32 = arith.constant 0 : i32
    %1 = arith.addi %0, %c0_i32 : i32
    %c0_i32_0 = arith.constant 0 : i32
    %c0_i32_1 = arith.constant 0 : i32
    %c0_i32_2 = arith.constant 0 : i32
    return %arg0, %1, %c0_i32_0, %c0_i32_1 : i32, i32, i32, i32
  }
  func.func @transform_4(%arg0: i32, %arg1: i32) -> (i32, i32, i32, i32) {
    %c2_i32 = arith.constant 2 : i32
    %0 = arith.muli %c2_i32, %arg1 : i32
    %c1_i32 = arith.constant 1 : i32
    %1 = arith.addi %0, %c1_i32 : i32
    %c0_i32 = arith.constant 0 : i32
    %c0_i32_0 = arith.constant 0 : i32
    %c0_i32_1 = arith.constant 0 : i32
    return %arg0, %1, %c0_i32, %c0_i32_0 : i32, i32, i32, i32
  }
  func.func @transform_5(%arg0: i32, %arg1: i32) -> (i32, i32, i32, i32) {
    %c2_i32 = arith.constant 2 : i32
    %0 = arith.muli %c2_i32, %arg1 : i32
    %c2_i32_0 = arith.constant 2 : i32
    %1 = arith.addi %0, %c2_i32_0 : i32
    %c0_i32 = arith.constant 0 : i32
    %c0_i32_1 = arith.constant 0 : i32
    %c0_i32_2 = arith.constant 0 : i32
    return %arg0, %1, %c0_i32, %c0_i32_1 : i32, i32, i32, i32
  }
  func.func @transform_6(%arg0: i32, %arg1: i32) -> (i32, i32, i32) {
    %c0_i32 = arith.constant 0 : i32
    %c0_i32_0 = arith.constant 0 : i32
    %c0_i32_1 = arith.constant 0 : i32
    %c0_i32_2 = arith.constant 0 : i32
    return %c0_i32, %c0_i32_0, %c0_i32_1 : i32, i32, i32
  }
  func.func @transform_7(%arg0: i32, %arg1: i32) -> (i32, i32) {
    %c0_i32 = arith.constant 0 : i32
    %c0_i32_0 = arith.constant 0 : i32
    %c0_i32_1 = arith.constant 0 : i32
    return %c0_i32, %c0_i32_0 : i32, i32
  }
  func.func @transform_8(%arg0: i32, %arg1: i32) -> (i32, i32, i32, i32) {
    %c0_i32 = arith.constant 0 : i32
    %c0_i32_0 = arith.constant 0 : i32
    %c0_i32_1 = arith.constant 0 : i32
    return %arg0, %arg1, %c0_i32, %c0_i32_0 : i32, i32, i32, i32
  }
}

module attributes {stable_mosaic.version = 11 : i64} {
  func.func @_fused_tail_kernel(%arg0: i32, %arg1: i32, %arg2: memref<1x1x4x9xf32, #tpu.memory_space<vmem>>, %arg3: memref<1x1x8x8xf32, #tpu.memory_space<vmem>>, %arg4: memref<1x1x8x8xf32, #tpu.memory_space<vmem>>, %arg5: memref<1x1x8x8xf32, #tpu.memory_space<vmem>>, %arg6: memref<9x8x8xf32, #tpu.memory_space<vmem>>, %arg7: memref<8x1xf32, #tpu.memory_space<vmem>>, %arg8: memref<8x4xf32, #tpu.memory_space<vmem>>, %arg9: memref<8x1xf32, #tpu.memory_space<vmem>>, %arg10: memref<8x8xf32, #tpu.memory_space<vmem>>, %arg11: memref<8x1xf32, #tpu.memory_space<vmem>>, %arg12: memref<1x1x8x8xf32, #tpu.memory_space<vmem>>) attributes {dimension_semantics = [#tpu.dimension_semantics<parallel>, #tpu.dimension_semantics<parallel>], iteration_bounds = array<i64: 2, 8>, scalar_prefetch = 0 : i64, scratch_operands = 0 : i64, tpu.core_type = #tpu.core_type<tc>, window_params = [{transform_indices = @transform_0, window_bounds = array<i64: 1, 1, 4, 9>}, {transform_indices = @transform_1, window_bounds = array<i64: 1, 1, 8, 8>}, {transform_indices = @transform_2, window_bounds = array<i64: 1, 1, 8, 8>}, {transform_indices = @transform_3, window_bounds = array<i64: 1, 1, 8, 8>}, {pipeline_mode = #tpu.pipeline_mode<synchronous>, transform_indices = @transform_4, window_bounds = array<i64: 9, 8, 8>}, {pipeline_mode = #tpu.pipeline_mode<synchronous>, transform_indices = @transform_5, window_bounds = array<i64: 8, 1>}, {pipeline_mode = #tpu.pipeline_mode<synchronous>, transform_indices = @transform_6, window_bounds = array<i64: 8, 4>}, {pipeline_mode = #tpu.pipeline_mode<synchronous>, transform_indices = @transform_7, window_bounds = array<i64: 8, 1>}, {pipeline_mode = #tpu.pipeline_mode<synchronous>, transform_indices = @transform_8, window_bounds = array<i64: 8, 8>}, {pipeline_mode = #tpu.pipeline_mode<synchronous>, transform_indices = @transform_9, window_bounds = array<i64: 8, 1>}, {transform_indices = @transform_10, window_bounds = array<i64: 1, 1, 8, 8>}]} {
    %cst = arith.constant 0.000000e+00 : f32
    %0 = vector.broadcast %cst : f32 to vector<8x8xf32>
    %cst_0 = arith.constant 0.000000e+00 : f32
    %1 = vector.broadcast %cst_0 : f32 to vector<8x1xf32>
    %c-1_i32 = arith.constant -1 : i32
    %2 = arith.addi %arg1, %c-1_i32 : i32
    %c0_i32 = arith.constant 0 : i32
    %3 = arith.cmpi sge, %2, %c0_i32 : i32
    %c8_i32 = arith.constant 8 : i32
    %4 = arith.cmpi slt, %2, %c8_i32 : i32
    %5 = arith.andi %3, %4 : i1
    %6 = arith.extui %5 : i1 to i32
    %7 = arith.sitofp %6 : i32 to f32
    %c0 = arith.constant 0 : index
    %c0_1 = arith.constant 0 : index
    %c0_2 = arith.constant 0 : index
    %c0_3 = arith.constant 0 : index
    %8 = vector.load %arg3[%c0, %c0_1, %c0_2, %c0_3] : memref<1x1x8x8xf32, #tpu.memory_space<vmem>>, vector<1x1x8x8xf32>
    %9 = vector.shape_cast %8 : vector<1x1x8x8xf32> to vector<8x8xf32>
    %10 = vector.broadcast %7 : f32 to vector<8x8xf32>
    %11 = arith.mulf %9, %10 : vector<8x8xf32>
    %12 = tpu.concatenate %1, %11, %1 in 1 : vector<8x1xf32>, vector<8x8xf32>, vector<8x1xf32> -> vector<8x10xf32>
    %c0_4 = arith.constant 0 : index
    %c0_5 = arith.constant 0 : index
    %c0_6 = arith.constant 0 : index
    %13 = vector.load %arg6[%c0_4, %c0_5, %c0_6] : memref<9x8x8xf32, #tpu.memory_space<vmem>>, vector<1x8x8xf32>
    %14 = vector.shape_cast %13 : vector<1x8x8xf32> to vector<8x8xf32>
    %15 = vector.extract_strided_slice %12 {offsets = [0, 0], sizes = [8, 8], strides = [1, 1]} : vector<8x10xf32> to vector<8x8xf32>
    %cst_7 = arith.constant dense<0.000000e+00> : vector<8x8xf32>
    %16 = tpu.matmul %14, %15, %cst_7 {dimension_numbers = #tpu.dot_dimension_numbers<[1], [0], [0], [1], [0, 0, 1, 1], [], []>} : vector<8x8xf32>, vector<8x8xf32>, vector<8x8xf32> -> vector<8x8xf32>
    %17 = arith.addf %0, %16 : vector<8x8xf32>
    %c1 = arith.constant 1 : index
    %c0_8 = arith.constant 0 : index
    %c0_9 = arith.constant 0 : index
    %18 = vector.load %arg6[%c1, %c0_8, %c0_9] : memref<9x8x8xf32, #tpu.memory_space<vmem>>, vector<1x8x8xf32>
    %19 = vector.shape_cast %18 : vector<1x8x8xf32> to vector<8x8xf32>
    %20 = vector.extract_strided_slice %12 {offsets = [0, 1], sizes = [8, 8], strides = [1, 1]} : vector<8x10xf32> to vector<8x8xf32>
    %cst_10 = arith.constant dense<0.000000e+00> : vector<8x8xf32>
    %21 = tpu.matmul %19, %20, %cst_10 {dimension_numbers = #tpu.dot_dimension_numbers<[1], [0], [0], [1], [0, 0, 1, 1], [], []>} : vector<8x8xf32>, vector<8x8xf32>, vector<8x8xf32> -> vector<8x8xf32>
    %22 = arith.addf %17, %21 : vector<8x8xf32>
    %c2 = arith.constant 2 : index
    %c0_11 = arith.constant 0 : index
    %c0_12 = arith.constant 0 : index
    %23 = vector.load %arg6[%c2, %c0_11, %c0_12] : memref<9x8x8xf32, #tpu.memory_space<vmem>>, vector<1x8x8xf32>
    %24 = vector.shape_cast %23 : vector<1x8x8xf32> to vector<8x8xf32>
    %25 = vector.extract_strided_slice %12 {offsets = [0, 2], sizes = [8, 8], strides = [1, 1]} : vector<8x10xf32> to vector<8x8xf32>
    %cst_13 = arith.constant dense<0.000000e+00> : vector<8x8xf32>
    %26 = tpu.matmul %24, %25, %cst_13 {dimension_numbers = #tpu.dot_dimension_numbers<[1], [0], [0], [1], [0, 0, 1, 1], [], []>} : vector<8x8xf32>, vector<8x8xf32>, vector<8x8xf32> -> vector<8x8xf32>
    %27 = arith.addf %22, %26 : vector<8x8xf32>
    %c0_i32_14 = arith.constant 0 : i32
    %28 = arith.addi %arg1, %c0_i32_14 : i32
    %c0_i32_15 = arith.constant 0 : i32
    %29 = arith.cmpi sge, %28, %c0_i32_15 : i32
    %c8_i32_16 = arith.constant 8 : i32
    %30 = arith.cmpi slt, %28, %c8_i32_16 : i32
    %31 = arith.andi %29, %30 : i1
    %32 = arith.extui %31 : i1 to i32
    %33 = arith.sitofp %32 : i32 to f32
    %c0_17 = arith.constant 0 : index
    %c0_18 = arith.constant 0 : index
    %c0_19 = arith.constant 0 : index
    %c0_20 = arith.constant 0 : index
    %34 = vector.load %arg4[%c0_17, %c0_18, %c0_19, %c0_20] : memref<1x1x8x8xf32, #tpu.memory_space<vmem>>, vector<1x1x8x8xf32>
    %35 = vector.shape_cast %34 : vector<1x1x8x8xf32> to vector<8x8xf32>
    %36 = vector.broadcast %33 : f32 to vector<8x8xf32>
    %37 = arith.mulf %35, %36 : vector<8x8xf32>
    %38 = tpu.concatenate %1, %37, %1 in 1 : vector<8x1xf32>, vector<8x8xf32>, vector<8x1xf32> -> vector<8x10xf32>
    %c3 = arith.constant 3 : index
    %c0_21 = arith.constant 0 : index
    %c0_22 = arith.constant 0 : index
    %39 = vector.load %arg6[%c3, %c0_21, %c0_22] : memref<9x8x8xf32, #tpu.memory_space<vmem>>, vector<1x8x8xf32>
    %40 = vector.shape_cast %39 : vector<1x8x8xf32> to vector<8x8xf32>
    %41 = vector.extract_strided_slice %38 {offsets = [0, 0], sizes = [8, 8], strides = [1, 1]} : vector<8x10xf32> to vector<8x8xf32>
    %cst_23 = arith.constant dense<0.000000e+00> : vector<8x8xf32>
    %42 = tpu.matmul %40, %41, %cst_23 {dimension_numbers = #tpu.dot_dimension_numbers<[1], [0], [0], [1], [0, 0, 1, 1], [], []>} : vector<8x8xf32>, vector<8x8xf32>, vector<8x8xf32> -> vector<8x8xf32>
    %43 = arith.addf %27, %42 : vector<8x8xf32>
    %c4 = arith.constant 4 : index
    %c0_24 = arith.constant 0 : index
    %c0_25 = arith.constant 0 : index
    %44 = vector.load %arg6[%c4, %c0_24, %c0_25] : memref<9x8x8xf32, #tpu.memory_space<vmem>>, vector<1x8x8xf32>
    %45 = vector.shape_cast %44 : vector<1x8x8xf32> to vector<8x8xf32>
    %46 = vector.extract_strided_slice %38 {offsets = [0, 1], sizes = [8, 8], strides = [1, 1]} : vector<8x10xf32> to vector<8x8xf32>
    %cst_26 = arith.constant dense<0.000000e+00> : vector<8x8xf32>
    %47 = tpu.matmul %45, %46, %cst_26 {dimension_numbers = #tpu.dot_dimension_numbers<[1], [0], [0], [1], [0, 0, 1, 1], [], []>} : vector<8x8xf32>, vector<8x8xf32>, vector<8x8xf32> -> vector<8x8xf32>
    %48 = arith.addf %43, %47 : vector<8x8xf32>
    %c5 = arith.constant 5 : index
    %c0_27 = arith.constant 0 : index
    %c0_28 = arith.constant 0 : index
    %49 = vector.load %arg6[%c5, %c0_27, %c0_28] : memref<9x8x8xf32, #tpu.memory_space<vmem>>, vector<1x8x8xf32>
    %50 = vector.shape_cast %49 : vector<1x8x8xf32> to vector<8x8xf32>
    %51 = vector.extract_strided_slice %38 {offsets = [0, 2], sizes = [8, 8], strides = [1, 1]} : vector<8x10xf32> to vector<8x8xf32>
    %cst_29 = arith.constant dense<0.000000e+00> : vector<8x8xf32>
    %52 = tpu.matmul %50, %51, %cst_29 {dimension_numbers = #tpu.dot_dimension_numbers<[1], [0], [0], [1], [0, 0, 1, 1], [], []>} : vector<8x8xf32>, vector<8x8xf32>, vector<8x8xf32> -> vector<8x8xf32>
    %53 = arith.addf %48, %52 : vector<8x8xf32>
    %c1_i32 = arith.constant 1 : i32
    %54 = arith.addi %arg1, %c1_i32 : i32
    %c0_i32_30 = arith.constant 0 : i32
    %55 = arith.cmpi sge, %54, %c0_i32_30 : i32
    %c8_i32_31 = arith.constant 8 : i32
    %56 = arith.cmpi slt, %54, %c8_i32_31 : i32
    %57 = arith.andi %55, %56 : i1
    %58 = arith.extui %57 : i1 to i32
    %59 = arith.sitofp %58 : i32 to f32
    %c0_32 = arith.constant 0 : index
    %c0_33 = arith.constant 0 : index
    %c0_34 = arith.constant 0 : index
    %c0_35 = arith.constant 0 : index
    %60 = vector.load %arg5[%c0_32, %c0_33, %c0_34, %c0_35] : memref<1x1x8x8xf32, #tpu.memory_space<vmem>>, vector<1x1x8x8xf32>
    %61 = vector.shape_cast %60 : vector<1x1x8x8xf32> to vector<8x8xf32>
    %62 = vector.broadcast %59 : f32 to vector<8x8xf32>
    %63 = arith.mulf %61, %62 : vector<8x8xf32>
    %64 = tpu.concatenate %1, %63, %1 in 1 : vector<8x1xf32>, vector<8x8xf32>, vector<8x1xf32> -> vector<8x10xf32>
    %c6 = arith.constant 6 : index
    %c0_36 = arith.constant 0 : index
    %c0_37 = arith.constant 0 : index
    %65 = vector.load %arg6[%c6, %c0_36, %c0_37] : memref<9x8x8xf32, #tpu.memory_space<vmem>>, vector<1x8x8xf32>
    %66 = vector.shape_cast %65 : vector<1x8x8xf32> to vector<8x8xf32>
    %67 = vector.extract_strided_slice %64 {offsets = [0, 0], sizes = [8, 8], strides = [1, 1]} : vector<8x10xf32> to vector<8x8xf32>
    %cst_38 = arith.constant dense<0.000000e+00> : vector<8x8xf32>
    %68 = tpu.matmul %66, %67, %cst_38 {dimension_numbers = #tpu.dot_dimension_numbers<[1], [0], [0], [1], [0, 0, 1, 1], [], []>} : vector<8x8xf32>, vector<8x8xf32>, vector<8x8xf32> -> vector<8x8xf32>
    %69 = arith.addf %53, %68 : vector<8x8xf32>
    %c7 = arith.constant 7 : index
    %c0_39 = arith.constant 0 : index
    %c0_40 = arith.constant 0 : index
    %70 = vector.load %arg6[%c7, %c0_39, %c0_40] : memref<9x8x8xf32, #tpu.memory_space<vmem>>, vector<1x8x8xf32>
    %71 = vector.shape_cast %70 : vector<1x8x8xf32> to vector<8x8xf32>
    %72 = vector.extract_strided_slice %64 {offsets = [0, 1], sizes = [8, 8], strides = [1, 1]} : vector<8x10xf32> to vector<8x8xf32>
    %cst_41 = arith.constant dense<0.000000e+00> : vector<8x8xf32>
    %73 = tpu.matmul %71, %72, %cst_41 {dimension_numbers = #tpu.dot_dimension_numbers<[1], [0], [0], [1], [0, 0, 1, 1], [], []>} : vector<8x8xf32>, vector<8x8xf32>, vector<8x8xf32> -> vector<8x8xf32>
    %74 = arith.addf %69, %73 : vector<8x8xf32>
    %c8 = arith.constant 8 : index
    %c0_42 = arith.constant 0 : index
    %c0_43 = arith.constant 0 : index
    %75 = vector.load %arg6[%c8, %c0_42, %c0_43] : memref<9x8x8xf32, #tpu.memory_space<vmem>>, vector<1x8x8xf32>
    %76 = vector.shape_cast %75 : vector<1x8x8xf32> to vector<8x8xf32>
    %77 = vector.extract_strided_slice %64 {offsets = [0, 2], sizes = [8, 8], strides = [1, 1]} : vector<8x10xf32> to vector<8x8xf32>
    %cst_44 = arith.constant dense<0.000000e+00> : vector<8x8xf32>
    %78 = tpu.matmul %76, %77, %cst_44 {dimension_numbers = #tpu.dot_dimension_numbers<[1], [0], [0], [1], [0, 0, 1, 1], [], []>} : vector<8x8xf32>, vector<8x8xf32>, vector<8x8xf32> -> vector<8x8xf32>
    %79 = arith.addf %74, %78 : vector<8x8xf32>
    %c0_45 = arith.constant 0 : index
    %c0_46 = arith.constant 0 : index
    %80 = vector.load %arg7[%c0_45, %c0_46] : memref<8x1xf32, #tpu.memory_space<vmem>>, vector<8x1xf32>
    %81 = vector.broadcast %80 : vector<8x1xf32> to vector<8x8xf32>
    %82 = arith.addf %79, %81 : vector<8x8xf32>
    %c0_47 = arith.constant 0 : index
    %c0_48 = arith.constant 0 : index
    %83 = vector.load %arg8[%c0_47, %c0_48] : memref<8x4xf32, #tpu.memory_space<vmem>>, vector<8x4xf32>
    %c0_49 = arith.constant 0 : index
    %c0_50 = arith.constant 0 : index
    %c0_51 = arith.constant 0 : index
    %c0_52 = arith.constant 0 : index
    %84 = vector.load %arg2[%c0_49, %c0_50, %c0_51, %c0_52] : memref<1x1x4x9xf32, #tpu.memory_space<vmem>>, vector<1x1x4x9xf32>
    %85 = vector.shape_cast %84 : vector<1x1x4x9xf32> to vector<4x9xf32>
    %86 = vector.extract_strided_slice %85 {offsets = [0, 0], sizes = [4, 8], strides = [1, 1]} : vector<4x9xf32> to vector<4x8xf32>
    %cst_53 = arith.constant dense<0.000000e+00> : vector<8x8xf32>
    %87 = tpu.matmul %83, %86, %cst_53 {dimension_numbers = #tpu.dot_dimension_numbers<[1], [0], [0], [1], [0, 0, 1, 1], [], []>} : vector<8x4xf32>, vector<4x8xf32>, vector<8x8xf32> -> vector<8x8xf32>
    %c0_54 = arith.constant 0 : index
    %c0_55 = arith.constant 0 : index
    %88 = vector.load %arg9[%c0_54, %c0_55] : memref<8x1xf32, #tpu.memory_space<vmem>>, vector<8x1xf32>
    %89 = vector.broadcast %88 : vector<8x1xf32> to vector<8x8xf32>
    %90 = arith.addf %87, %89 : vector<8x8xf32>
    %c0_56 = arith.constant 0 : index
    %c0_57 = arith.constant 0 : index
    %91 = vector.load %arg10[%c0_56, %c0_57] : memref<8x8xf32, #tpu.memory_space<vmem>>, vector<8x8xf32>
    %92 = arith.mulf %82, %82 : vector<8x8xf32>
    %cst_58 = arith.constant dense<0.000000e+00> : vector<8x8xf32>
    %93 = tpu.matmul %91, %92, %cst_58 {dimension_numbers = #tpu.dot_dimension_numbers<[1], [0], [0], [1], [0, 0, 1, 1], [], []>} : vector<8x8xf32>, vector<8x8xf32>, vector<8x8xf32> -> vector<8x8xf32>
    %c0_59 = arith.constant 0 : index
    %c0_60 = arith.constant 0 : index
    %94 = vector.load %arg11[%c0_59, %c0_60] : memref<8x1xf32, #tpu.memory_space<vmem>>, vector<8x1xf32>
    %95 = vector.broadcast %94 : vector<8x1xf32> to vector<8x8xf32>
    %96 = arith.addf %93, %95 : vector<8x8xf32>
    %97 = math.rsqrt %96 : vector<8x8xf32>
    %98 = arith.mulf %82, %97 : vector<8x8xf32>
    %99 = arith.addf %98, %90 : vector<8x8xf32>
    %c0_61 = arith.constant 0 : index
    %c0_62 = arith.constant 0 : index
    %c0_63 = arith.constant 0 : index
    %c0_64 = arith.constant 0 : index
    %100 = vector.load %arg12[%c0_61, %c0_62, %c0_63, %c0_64] : memref<1x1x8x8xf32, #tpu.memory_space<vmem>>, vector<1x1x8x8xf32>
    %101 = vector.shape_cast %100 : vector<1x1x8x8xf32> to vector<8x8xf32>
    %102 = vector.shape_cast %99 : vector<8x8xf32> to vector<1x1x8x8xf32>
    tpu.vector_store %arg12[%c0_61, %c0_62, %c0_63, %c0_64], %102 {strides = array<i32>} : memref<1x1x8x8xf32, #tpu.memory_space<vmem>>, vector<1x1x8x8xf32>,
    return
  }
  func.func @transform_0(%arg0: i32, %arg1: i32) -> (i32, i32, i32, i32) {
    %c2_i32 = arith.constant 2 : i32
    %0 = arith.muli %c2_i32, %arg1 : i32
    %c1_i32 = arith.constant 1 : i32
    %1 = arith.addi %0, %c1_i32 : i32
    %c0_i32 = arith.constant 0 : i32
    %c0_i32_0 = arith.constant 0 : i32
    %c0_i32_1 = arith.constant 0 : i32
    return %arg0, %1, %c0_i32, %c0_i32_0 : i32, i32, i32, i32
  }
  func.func @transform_1(%arg0: i32, %arg1: i32) -> (i32, i32, i32, i32) {
    %c1_i32 = arith.constant 1 : i32
    %0 = arith.subi %arg1, %c1_i32 : i32
    %c0_i32 = arith.constant 0 : i32
    %1 = arith.addi %0, %c0_i32 : i32
    %c0_i32_0 = arith.constant 0 : i32
    %c7_i32 = arith.constant 7 : i32
    %2 = arith.maxsi %c0_i32_0, %1 : i32
    %3 = arith.minsi %c7_i32, %2 : i32
    %c0_i32_1 = arith.constant 0 : i32
    %c0_i32_2 = arith.constant 0 : i32
    %c0_i32_3 = arith.constant 0 : i32
    return %arg0, %3, %c0_i32_1, %c0_i32_2 : i32, i32, i32, i32
  }
  func.func @transform_2(%arg0: i32, %arg1: i32) -> (i32, i32, i32, i32) {
    %c1_i32 = arith.constant 1 : i32
    %0 = arith.subi %arg1, %c1_i32 : i32
    %c1_i32_0 = arith.constant 1 : i32
    %1 = arith.addi %0, %c1_i32_0 : i32
    %c0_i32 = arith.constant 0 : i32
    %c7_i32 = arith.constant 7 : i32
    %2 = arith.maxsi %c0_i32, %1 : i32
    %3 = arith.minsi %c7_i32, %2 : i32
    %c0_i32_1 = arith.constant 0 : i32
    %c0_i32_2 = arith.constant 0 : i32
    %c0_i32_3 = arith.constant 0 : i32
    return %arg0, %3, %c0_i32_1, %c0_i32_2 : i32, i32, i32, i32
  }
  func.func @transform_3(%arg0: i32, %arg1: i32) -> (i32, i32, i32, i32) {
    %c1_i32 = arith.constant 1 : i32
    %0 = arith.subi %arg1, %c1_i32 : i32
    %c2_i32 = arith.constant 2 : i32
    %1 = arith.addi %0, %c2_i32 : i32
    %c0_i32 = arith.constant 0 : i32
    %c7_i32 = arith.constant 7 : i32
    %2 = arith.maxsi %c0_i32, %1 : i32
    %3 = arith.minsi %c7_i32, %2 : i32
    %c0_i32_0 = arith.constant 0 : i32
    %c0_i32_1 = arith.constant 0 : i32
    %c0_i32_2 = arith.constant 0 : i32
    return %arg0, %3, %c0_i32_0, %c0_i32_1 : i32, i32, i32, i32
  }
  func.func @transform_4(%arg0: i32, %arg1: i32) -> (i32, i32, i32) {
    %c0_i32 = arith.constant 0 : i32
    %c0_i32_0 = arith.constant 0 : i32
    %c0_i32_1 = arith.constant 0 : i32
    %c0_i32_2 = arith.constant 0 : i32
    return %c0_i32, %c0_i32_0, %c0_i32_1 : i32, i32, i32
  }
  func.func @transform_5(%arg0: i32, %arg1: i32) -> (i32, i32) {
    %c0_i32 = arith.constant 0 : i32
    %c0_i32_0 = arith.constant 0 : i32
    %c0_i32_1 = arith.constant 0 : i32
    return %c0_i32, %c0_i32_0 : i32, i32
  }
  func.func @transform_6(%arg0: i32, %arg1: i32) -> (i32, i32) {
    %c0_i32 = arith.constant 0 : i32
    %c0_i32_0 = arith.constant 0 : i32
    %c0_i32_1 = arith.constant 0 : i32
    return %c0_i32, %c0_i32_0 : i32, i32
  }
  func.func @transform_7(%arg0: i32, %arg1: i32) -> (i32, i32) {
    %c0_i32 = arith.constant 0 : i32
    %c0_i32_0 = arith.constant 0 : i32
    %c0_i32_1 = arith.constant 0 : i32
    return %c0_i32, %c0_i32_0 : i32, i32
  }
  func.func @transform_8(%arg0: i32, %arg1: i32) -> (i32, i32) {
    %c0_i32 = arith.constant 0 : i32
    %c0_i32_0 = arith.constant 0 : i32
    %c0_i32_1 = arith.constant 0 : i32
    return %c0_i32, %c0_i32_0 : i32, i32
  }
  func.func @transform_9(%arg0: i32, %arg1: i32) -> (i32, i32) {
    %c0_i32 = arith.constant 0 : i32
    %c0_i32_0 = arith.constant 0 : i32
    %c0_i32_1 = arith.constant 0 : i32
    return %c0_i32, %c0_i32_0 : i32, i32
  }
  func.func @transform_10(%arg0: i32, %arg1: i32) -> (i32, i32, i32, i32) {
    %c0_i32 = arith.constant 0 : i32
    %c0_i32_0 = arith.constant 0 : i32
    %c0_i32_1 = arith.constant 0 : i32
    return %arg0, %arg1, %c0_i32, %c0_i32_0 : i32, i32, i32, i32
  }
}

</mosaic_0001>

<bundles_post_ra>
// kernel: residual_block_with_stride_m.2
= control target key start
LH: loop header
LB: loop body
LE: loop exit
PB: predicated region body
PF: predicated region fallthrough
CT: control target
= control target key end

     0   :  { %s1727_s27 = smov 0   ;;  %s1729_s28 = smov 0   ;;  %s1892_s0 = inlined_call_operand.vmem [shape: f32[2,18,4,9], index: 0, kind: input, shape index: {}, may-alias: {0,1,2}]   ;;  %s1893_s1 = inlined_call_operand.vmem [shape: f32[2,18,4,9], index: 1, kind: input, shape index: {}, may-alias: {0,1,2}]   ;;  %s1894_s2 = inlined_call_operand.vmem [shape: f32[2,18,4,9], index: 2, kind: input, shape index: {}, may-alias: {0,1,2}]   ;;  %s1895_s3 = inlined_call_operand.vmem [shape: f32[2,18,4,9], index: 3, kind: input, shape index: {}, may-alias: {3,4,5}]   ;;  %s1896_s4 = inlined_call_operand.vmem [shape: f32[2,18,4,9], index: 4, kind: input, shape index: {}, may-alias: {3,4,5}]   ;;  %s1897_s5 = inlined_call_operand.vmem [shape: f32[2,18,4,9], index: 5, kind: input, shape index: {}, may-alias: {3,4,5}]   ;;  %s1898_s6 = inlined_call_operand.vmem [shape: f32[9,8,4], index: 6, kind: input, shape index: {}]   ;;  %s1899_s7 = inlined_call_operand.vmem [shape: f32[8,1], index: 7, kind: input, shape index: {}]   ;;  %s1900_s8 = inlined_call_operand.vmem [shape: f32[2,8,8,8], index: 8, kind: output, shape index: {}]  }
   0x1   :  { %s1731_s29 = smov 0   ;;  %s1733_s30 = smov 0  }
   0x2   :  { %s1735_s9 = smov 0  }
   0x3 LB: > { %s27_s10 = sadd.s32 1, %s1668_s29  ;;  %s30_s11 = sadd.s32 1, %s1672_s30  ;;  %s1676_s9 = sphi %s1735_s9, %s18_s9   ;;  %s1672_s30 = sphi %s1733_s30, %s1904_s30   ;;  %s1668_s29 = sphi %s1731_s29, %s1903_s29   ;;  %s1664_s28 = sphi %s1729_s28, %s1902_s28   ;;  %s1660_s27 = sphi %s1727_s27, %s1901_s27  }
   0x4   : > { %p28_p0 = scmp.ge.s32.totalorder %s27_s10, 8  ;;  %p1485_p1 = scmp.ge.s32.totalorder %s1676_s9, 1 }
   0x5   : > { %p396_p2 = scmp.lt.s32.totalorder %s1676_s9, 17 }
   0x6   : > { %s1906_s10 = smov (%p28_p0, %s27_s10), 0  ;;  %s1908_s11 = smov (!%p28_p0, %s30_s11), %s1672_s30 }
   0x7   : > { %p397_p3 = pnand %p1485_p1, %p396_p2  ;;  %p32_p4 = scmp.ge.s32.totalorder %s1908_s11, 2 }
   0x8   : > { %s1760_s12 = sshll.u32 (!%p397_p3), %s1660_s27, 1  ;;  %p487_p5 = scmp.lt.s32.totalorder (!%p397_p3), %s1664_s28, 1  ;;  %v1678_v0 = vmov (!%p397_p3), 0.0   ;;  %vm1679_vm0 = vmmov (!%p397_p3), 0   ;;  %vm571_vm1 = vcmask (!%p397_p3), 1043456   ;;  %v1500_v1 = vld [vmem:[%s1898_s6 + $0x8] sm:$0xff] (!%p397_p3) }
   0x9   : > { %s1910_s11 = smov (%p32_p4, %s1908_s11), 0  ;;  %400 = sbr.rel (%p397_p3) target bundleno = 372 (0x174), region = 52 }
   0xa   : > { %p489_p6 = scmp.lt.s32.totalorder (!%p397_p3), %s1760_s12, 17  ;;  %1546 = vmatprep.subr.mxu0 (!%p397_p3), %v1678_v0  ;;  %1548 = vmatprep.mubr.msk.f32.mxu0 (!%p397_p3), %vm1679_vm0, %v1678_v0  ;;  %s497_s15 = sadd.s32 (!%p397_p3), 1, %s1760_s12  ;;  %vm567_vm2 = vcmask (!%p397_p3), 31744   ;;  %v564_v4 = vld [vmem:[%s1898_s6] sm:$0xff] (!%p397_p3)  ;;  %v1508_v5 = vld [vmem:[%s1898_s6 + $0x18] sm:$0xff] (!%p397_p3)  ;;  %v1681_v7 = vmov (!%p397_p3), 0  }
   0xb   : > { %1551 = vmatprep.subr.mxu1 (!%p397_p3), %v1678_v0  ;;  %1553 = vmatprep.mubr.msk.f32.mxu1 (!%p397_p3), %vm1679_vm0, %v1678_v0  ;;  %s509_s16 = sadd.s32 (!%p397_p3), 2, %s1760_s12  ;;  %p500_p7 = scmp.lt.s32.totalorder (!%p397_p3), %s497_s15, 17  ;;  %v1281_v9 = vld [vmem:[%s1899_s7] sm:$0xff] (!%p397_p3)  ;;  %v1505_v10 = vld [vmem:[%s1898_s6 + $0x10] sm:$0xff] (!%p397_p3)  ;;  %v1514_v14 = vld [vmem:[%s1898_s6 + $0x28] sm:$0xff] (!%p397_p3)  ;;  %vm1291_vm3 = vcmask (!%p397_p3), 64512  }
   0xc   : > { %p512_p8 = scmp.lt.s32.totalorder (!%p397_p3), %s509_s16, 17  ;;  %1636 = vset.pattern.permute.xlu1 (!%p397_p3), %v1681_v7  ;;  %1637 = vset.pattern.permute.xlu0 (!%p397_p3), %v1681_v7  ;;  %v1511_v13 = vld [vmem:[%s1898_s6 + $0x20] sm:$0xff] (!%p397_p3)  ;;  %v1517_v17 = vld [vmem:[%s1898_s6 + $0x30] sm:$0xff] (!%p397_p3)  ;;  %v1520_v19 = vld [vmem:[%s1898_s6 + $0x38] sm:$0xff] (!%p397_p3)  ;;  %p556_p9 = scmp.lt.s32.totalorder (!%p397_p3), %s1660_s27, 7 }
   0xd   : > { %v1523_v20 = vld [vmem:[%s1898_s6 + $0x40] sm:$0xff] (!%p397_p3) }
  0x10   : > { %s1912_s28 = smov (!%p487_p5, %s1664_s28), 1  ;;  %s1914_s15 = smov (!%p500_p7, %s497_s15), 17 }
  0x11   : > { %s490_s13 = scalar_select %p489_p6, %s1760_s12, 17 }
  0x12   : > { %s1773_s14 = smul.u32 18, %s1912_s28  ;;  %s1916_s16 = smov (!%p512_p8, %s509_s16), 17 }
  0x13   : > { %s1918_s27 = smov (!%p556_p9, %s1660_s27), 7  ;;  %s1498_s22 = sshll.u32 %s1912_s28, 3 }
  0x14   : > { %s492_s17 = sadd.s32 %s1773_s14, %s490_s13  ;;  %s503_s19 = sadd.s32 %s1773_s14, %s1914_s15 }
  0x15   : > { %s1487_s18 = sshll.u32 %s492_s17, 2  ;;  %s1680_s17 = smov 127  }
  0x16   : > { %s494_s21 = scalar_lea.vmem %s1892_s0, %s1487_s18  ;;  %s528_s24 = scalar_lea.vmem %s1895_s3, %s1487_s18 }
  0x17   : > { %v562_v2 = vld [vmem:[%s494_s21] sm:$0xf]  ;;  %s1489_s18 = sshll.u32 %s503_s19, 2  ;;  %s515_s20 = sadd.s32 %s1773_s14, %s1916_s16 }
  0x18   : > { %v563_v3 = vld [vmem:[%s528_s24] sm:$0xf]  ;;  %723 = vrot.lane.b32.xlu0 %v562_v2, %s1680_s17  ;;  %1552 = vmatpush3.msk.msra.mxu1 %vm571_vm1, %v562_v2  ;;  %s505_s23 = scalar_lea.vmem %s1893_s1, %s1489_s18  ;;  %s1806_s25 = sshll.u32 %s515_s20, 2 }
  0x19   : > { %1547 = vmatpush3.msk.msra.mxu0 %vm571_vm1, %v563_v3  ;;  %1554 = vmatmul.mubr.msk.f32.vlgmr.msra.gmra.mrb[0].mxu1 %vm567_vm2, %v564_v4  ;;  %v801_v6 = vld [vmem:[%s505_s23] sm:$0xf]  ;;  %s517_s26 = scalar_lea.vmem %s1894_s2, %s1806_s25  ;;  %s539_s21 = scalar_lea.vmem %s1896_s4, %s1489_s18 }
  0x1a   : > { %1549 = vmatmul.mubr.msk.f32.vlgmr.msra.gmra.mrb[0].mxu0 %vm567_vm2, %v1500_v1  ;;  %1556 = vmatprep.subr.mxu0 %v1678_v0  ;;  %v1041_v8 = vld [vmem:[%s517_s26] sm:$0xf]  ;;  %s551_s24 = scalar_lea.vmem %s1897_s5, %s1806_s25  ;;  %s559_s23 = sadd.s32 %s1498_s22, %s1918_s27 }
  0x1b   : > { %1558 = vmatprep.mubr.msk.f32.mxu0 %vm1679_vm0, %v1678_v0  ;;  %1561 = vmatprep.subr.mxu1 %v1678_v0  ;;  %v802_v11 = vld [vmem:[%s539_s21] sm:$0xf] }
  0x1c   : > { %1563 = vmatprep.mubr.msk.f32.mxu1 %vm1679_vm0, %v1678_v0  ;;  %963 = vrot.lane.b32.xlu0 %v801_v6, %s1680_s17  ;;  %v1042_v16 = vld [vmem:[%s551_s24] sm:$0xf] }
  0x1d   : > { %1562 = vmatpush3.msk.msra.mxu1 %vm571_vm1, %v801_v6  ;;  %1203 = vrot.lane.b32.xlu1 %v1041_v8, %s1680_s17  ;;  %s1499_s17 = sshll.u32 %s559_s23, 3 }
  0x1e   : > { %1564 = vmatmul.mubr.msk.f32.vlgmr.msra.gmra.mrb[2].mxu1 %vm567_vm2, %v1508_v5  ;;  %1571 = vmatprep.subr.mxu1 %v1678_v0  ;;  %s561_s18 = scalar_lea.vmem %s1900_s8, %s1499_s17 }
  0x1f   : > { %1573 = vmatprep.mubr.msk.f32.mxu1 %vm1679_vm0, %v1678_v0 }
  0x21   : > { %1284 = vperm.xlu1 %1636, %v1281_v9  }
  0x8a   : > { %v724_v12 = vpop.permute.xlu0 %723 }
  0x8b   : > { %1557 = vmatpush3.msk.msra.mxu0 %vm571_vm1, %v724_v12 }
  0x8c   : > { %1559 = vmatmul.mubr.msk.f32.vlgmr.msra.gmra.mrb[2].mxu0 %vm567_vm2, %v1505_v10  ;;  %1566 = vmatprep.subr.mxu0 %v1678_v0 }
  0x8d   : > { %1567 = vmatpush3.msk.msra.mxu0 %vm571_vm1, %v802_v11  ;;  %1568 = vmatprep.mubr.msk.f32.mxu0 %vm1679_vm0, %v1678_v0 }
  0x8e   : > { %1576 = vmatprep.subr.mxu0 %v1678_v0  ;;  %v964_v15 = vpop.permute.xlu0 %963 }
  0x8f   : > { %1572 = vmatpush3.msk.msra.mxu1 %vm571_vm1, %v964_v15  ;;  %v1204_v18 = vpop.permute.xlu1 %1203 }
  0x90   : > { %1569 = vmatmul.mubr.msk.f32.vlgmr.msra.gmra.mrb[4].mxu0 %vm567_vm2, %v1511_v13  ;;  %1574 = vmatmul.mubr.msk.f32.vlgmr.msra.gmra.mrb[4].mxu1 %vm567_vm2, %v1514_v14 }
  0x91   : > { %1577 = vmatpush3.msk.msra.mxu0 %vm571_vm1, %v1041_v8  ;;  %1578 = vmatprep.mubr.msk.f32.mxu0 %vm1679_vm0, %v1678_v0 }
  0x92   : > { %1581 = vmatprep.subr.mxu1 %v1678_v0  ;;  %1583 = vmatprep.mubr.msk.f32.mxu1 %vm1679_vm0, %v1678_v0 }
  0x93   : > { %1582 = vmatpush3.msk.msra.mxu1 %vm571_vm1, %v1042_v16  ;;  %1586 = vmatprep.subr.mxu0 %v1678_v0 }
  0x94   : > { %1579 = vmatmul.mubr.msk.f32.vlgmr.msra.gmra.mrb[6].mxu0 %vm567_vm2, %v1517_v17  ;;  %1584 = vmatmul.mubr.msk.f32.vlgmr.msra.gmra.mrb[6].mxu1 %vm567_vm2, %v1520_v19 }
  0x95   : > { %1587 = vmatpush3.msk.msra.mxu0 %vm571_vm1, %v1204_v18  ;;  %1588 = vmatprep.mubr.msk.f32.mxu0 %vm1679_vm0, %v1678_v0 }
  0x98   : > { %1589 = vmatmul.mubr.msk.f32.vlgmr.msra.gmra.mrb[8].mxu0 %vm567_vm2, %v1523_v20 }
  0xa0   : > { %v1285_v45 = vpop.permute.xlu1 %1284 }
  0xec   : > { %v717_v22 = vpop.f32.mrb[0].mxu1 }
  0xed   : > { %v641_v21 = vpop.f32.mrb[0].mxu0  ;;  %v1555_v25 = vpop.f32.mrb[1].mxu1 }
  0xee   : > { %v1550_v23 = vpop.f32.mrb[1].mxu0  ;;  %v718_v24 = vadd.f32 %v717_v22, %v641_v21 }
  0xf1   : > { %v877_v26 = vpop.f32.mrb[2].mxu1 }
  0xf2   : > { %v1565_v27 = vpop.f32.mrb[3].mxu1 }
 0x15f   : > { %v796_v28 = vpop.f32.mrb[2].mxu0 }
 0x160   : > { %v800_v29 = vadd.f32 %v796_v28, %v718_v24  ;;  %v1560_v30 = vpop.f32.mrb[3].mxu0 }
 0x162   : > { %v881_v31 = vadd.f32 %v877_v26, %v800_v29 }
 0x163   : > { %v956_v32 = vpop.f32.mrb[4].mxu0  ;;  %v1036_v34 = vpop.f32.mrb[4].mxu1 }
 0x164   : > { %v960_v33 = vadd.f32 %v956_v32, %v881_v31  ;;  %v1570_v35 = vpop.f32.mrb[5].mxu0  ;;  %v1575_v36 = vpop.f32.mrb[5].mxu1 }
 0x166   : > { %v1040_v37 = vadd.f32 %v1036_v34, %v960_v33 }
 0x167   : > { %v1117_v38 = vpop.f32.mrb[6].mxu0  ;;  %v1196_v40 = vpop.f32.mrb[6].mxu1 }
 0x168   : > { %v1121_v39 = vadd.f32 %v1117_v38, %v1040_v37  ;;  %v1580_v41 = vpop.f32.mrb[7].mxu0  ;;  %v1585_v42 = vpop.f32.mrb[7].mxu1 }
 0x16a   : > { %v1200_v43 = vadd.f32 %v1196_v40, %v1121_v39 }
 0x16b   : > { %v1276_v44 = vpop.f32.mrb[8].mxu0 }
 0x16c   : > { %v1280_v46 = vadd.f32 %v1276_v44, %v1200_v43  ;;  %v1590_v47 = vpop.f32.mrb[9].mxu0 }
 0x16e   : > { %v1287_v48 = vadd.f32 %v1285_v45, %v1280_v46 }
 0x170   : > { %vm1288_vm4 = vcmp.ge.f32.partialorder %v1287_v48, 0.0  ;;  %v1289_v49 = vmul.f32 0.01, %v1287_v48 }
 0x172   : > { %v1290_v50 = vsel %vm1288_vm4, %v1287_v48, %v1289_v49 }
 0x173   : > { %1292 = vst.msk [vmem:[%s561_s18] sm:$0xff] %vm1291_vm3, %v1290_v50 }
 0x174 PF: > { %s18_s9 = sadd.s32 1, %s1676_s9   ;;  %s1901_s27 = smov %s1668_s29 }
 0x175   : > { %p15_p10 = scmp.ge.s32.totalorder %s18_s9, 18   ;;  %s1902_s28 = smov %s1672_s30 }
 0x176   : > { %s1903_s29 = smov %s1906_s10  ;;  %s1904_s30 = smov %s1910_s11 }
 0x177   :  { %17 = sbr.rel (!%p15_p10) target bundleno = 3 (0x3), region = 105 }

// kernel: residual_block_with_stride_m.3
= control target key start
LH: loop header
LB: loop body
LE: loop exit
PB: predicated region body
PF: predicated region fallthrough
CT: control target
= control target key end

     0   :  { %s2006_s13 = smov 0   ;;  %s2008_s14 = smov 0   ;;  %s2194_s0 = inlined_call_operand.vmem [shape: f32[2,18,4,9], index: 0, kind: input, shape index: {}]   ;;  %s2195_s1 = inlined_call_operand.vmem [shape: f32[2,8,8,8], index: 1, kind: input, shape index: {}, may-alias: {1,2,3}]   ;;  %s2196_s2 = inlined_call_operand.vmem [shape: f32[2,8,8,8], index: 2, kind: input, shape index: {}, may-alias: {1,2,3}]   ;;  %s2197_s3 = inlined_call_operand.vmem [shape: f32[2,8,8,8], index: 3, kind: input, shape index: {}, may-alias: {1,2,3}]   ;;  %s2198_s4 = inlined_call_operand.vmem [shape: f32[9,8,8], index: 4, kind: input, shape index: {}]   ;;  %s2199_s5 = inlined_call_operand.vmem [shape: f32[8,1], index: 5, kind: input, shape index: {}]   ;;  %s2200_s6 = inlined_call_operand.vmem [shape: f32[8,4], index: 6, kind: input, shape index: {}]   ;;  %s2201_s7 = inlined_call_operand.vmem [shape: f32[8,1], index: 7, kind: input, shape index: {}]   ;;  %s2202_s8 = inlined_call_operand.vmem [shape: f32[8,8], index: 8, kind: input, shape index: {}]   ;;  %s2203_s9 = inlined_call_operand.vmem [shape: f32[8,1], index: 9, kind: input, shape index: {}]   ;;  %s2204_s10 = inlined_call_operand.vmem [shape: f32[2,8,8,8], index: 10, kind: output, shape index: {}]  }
   0x1   :  { %2205 = sst [smem:[#allocation3_spill]] %s2195_s1  ;;  %s2010_s15 = smov 0  }
   0x2   :  { %s2012_s16 = smov 0   ;;  %s2014_s17 = smov 0  }
   0x3 LB: > { %s29_s18 = sadd.s32 1, %s1935_s15  ;;  %s32_s19 = sadd.s32 1, %s1939_s16  ;;  %s1943_s17 = sphi %s2014_s17, %s20_s17   ;;  %s1939_s16 = sphi %s2012_s16, %s2213_s16   ;;  %s1935_s15 = sphi %s2010_s15, %s2212_s15   ;;  %s1931_s14 = sphi %s2008_s14, %s2211_s14   ;;  %s1927_s13 = sphi %s2006_s13, %s2210_s13  }
   0x4   : > { %p30_p0 = scmp.ge.s32.totalorder %s29_s18, 8  ;;  %p1704_p1 = scmp.ge.s32.totalorder %s1943_s17, 1 }
   0x5   : > { %p440_p2 = scmp.lt.s32.totalorder %s1943_s17, 17 }
   0x6   : > { %s2215_s18 = smov (%p30_p0, %s29_s18), 0  ;;  %s2217_s19 = smov (!%p30_p0, %s32_s19), %s1939_s16 }
   0x7   : > { %p441_p3 = pnand %p1704_p1, %p440_p2  ;;  %p34_p4 = scmp.ge.s32.totalorder %s2217_s19, 2 }
   0x8   : > { %p526_p5 = scmp.lt.s32.totalorder (!%p441_p3), %s1931_s14, 1  ;;  %s1707_s20 = sadd.s32 (!%p441_p3), 4294967295, %s1927_s13  ;;  %v1945_v0 = vmov (!%p441_p3), 0.0   ;;  %vm1946_vm0 = vmmov (!%p441_p3), 0   ;;  %vm610_vm1 = vcmask (!%p441_p3), 7168   ;;  %vm612_vm2 = vcmask (!%p441_p3), 72704  }
   0x9   : > { %s2219_s19 = smov (%p34_p4, %s2217_s19), 0  ;;  %444 = sbr.rel (%p441_p3) target bundleno = 729 (0x2d9), region = 60 }
   0xa   : > { %2206 = sst [smem:[#allocation2_spill]] %s2219_s19  ;;  %p537_p6 = scmp.gt.s32.totalorder (!%p441_p3), %s1707_s20, 0  ;;  %1804 = vmatprep.subr.mxu1 (!%p441_p3), %v1945_v0  ;;  %1799 = vmatprep.subr.mxu0 (!%p441_p3), %v1945_v0  ;;  %v614_v12 = vld [vmem:[%s2198_s4] sm:$0xff] (!%p441_p3)  ;;  %vm621_vm3 = vcmask (!%p441_p3), 64512   ;;  %v1739_v16 = vld [vmem:[%s2198_s4 + $0x18] sm:$0xff] (!%p441_p3)  ;;  %v1950_v18 = vmov (!%p441_p3), 0  }
   0xb   : > { %p1708_p7 = scmp.lt.s32.totalorder (!%p441_p3), %s1707_s20, 7  ;;  %p1715_p8 = scmp.lt.s32.totalorder (!%p441_p3), %s1927_s13, 7  ;;  %1806 = vmatprep.mubr.msk.f32.mxu1 (!%p441_p3), %vm1946_vm0, %v1945_v0  ;;  %1801 = vmatprep.mubr.msk.f32.mxu0 (!%p441_p3), %vm1946_vm0, %v1945_v0  ;;  %v1348_v22 = vld [vmem:[%s2199_s5] sm:$0xff] (!%p441_p3)  ;;  %v1732_v24 = vld [vmem:[%s2198_s4 + $0x8] sm:$0xff] (!%p441_p3)  ;;  %v1736_v27 = vld [vmem:[%s2198_s4 + $0x10] sm:$0xff] (!%p441_p3)  ;;  %vm1367_vm4 = vcmask (!%p441_p3), 1043456  }
   0xc   : > { %p597_p10 = scmp.ge.s32.totalorder (!%p441_p3), %s1707_s20, 0  ;;  %p598_p11 = scmp.lt.s32.totalorder (!%p441_p3), %s1707_s20, 8  ;;  %1901 = vset.pattern.permute.xlu1 (!%p441_p3), %v1950_v18  ;;  %1902 = vset.pattern.permute.xlu0 (!%p441_p3), %v1950_v18  ;;  %v1357_v23 = vld [vmem:[%s2201_s7] sm:$0xff] (!%p441_p3)  ;;  %v1744_v31 = vld [vmem:[%s2198_s4 + $0x28] sm:$0xff] (!%p441_p3)  ;;  %v1747_v32 = vld [vmem:[%s2198_s4 + $0x30] sm:$0xff] (!%p441_p3)  ;;  %vm1363_vm5 = vcmask (!%p441_p3), 31744  }
   0xd   : > { %s2207_s1 = sld [smem:[#allocation3_spill]] (!%p441_p3)  ;;  %p554_p13 = scmp.gt.s32.totalorder (!%p441_p3), %s1927_s13, 0  ;;  %v1742_v28 = vld [vmem:[%s2198_s4 + $0x20] sm:$0xff] (!%p441_p3)  ;;  %v1750_v33 = vld [vmem:[%s2198_s4 + $0x38] sm:$0xff] (!%p441_p3) }
   0xe   : > { %p599_p12 = pnand (!%p441_p3), %p598_p11, %p597_p10  ;;  %p847_p0 = scmp.ge.s32.totalorder (!%p441_p3), %s1927_s13, 0  ;;  %v1752_v34 = vld [vmem:[%s2198_s4 + $0x40] sm:$0xff] (!%p441_p3) }
   0xf   : > { %p848_p1 = scmp.lt.s32.totalorder (!%p441_p3), %s1927_s13, 8  ;;  %s1949_s19 = smov (!%p441_p3), 127   ;;  %v1355_v38 = vld [vmem:[%s2200_s6] sm:$0xff] (!%p441_p3) }
  0x10   : > { %s2221_s14 = smov (!%p526_p5, %s1931_s14), 1  ;;  %v1443_v43 = vld [vmem:[%s2203_s9] sm:$0xff] }
  0x11   : > { %s538_s21 = scalar_select %p537_p6, %s1707_s20, 0 }
  0x12   : > { %s2042_s22 = sshll.u32 %s2221_s14, 3  ;;  %s570_s20 = sadd.s32 1, %s1927_s13 }
  0x13   : > { %s2223_s21 = smov (!%p1708_p7, %s538_s21), 7  ;;  %p571_p3 = scmp.gt.s32.totalorder %s570_s20, 0 }
  0x14   : > { %s2048_s23 = scalar_select %p1715_p8, %s1927_s13, 7 }
  0x15   : > { %p543_p9 = scmp.lt.s32.totalorder %s2223_s21, 7  ;;  %p849_p4 = pnand %p848_p1, %p847_p0 }
  0x16   : > { %s1731_s30 = scalar_select %p599_p12, 0, 1 }
  0x17   : > { %s2225_s21 = smov (!%p543_p9, %s2223_s21), 7  ;;  %p1722_p5 = scmp.lt.s32.totalorder %s570_s20, 7 }
  0x18   : > { %s546_s25 = sadd.s32 %s2042_s22, %s2225_s21  ;;  %s602_s12 = scvt.s32.f32 %s1731_s30 }
  0x19   : > { %s1714_s26 = sshll.u32 %s546_s25, 3  ;;  %s1947_s21 = smov 1  }
  0x1a   : > { %s548_s29 = scalar_lea.vmem %s2207_s1, %s1714_s26  ;;  %v604_v2 = vstv %s602_s12  ;;  %p1098_p6 = scmp.ge.s32.totalorder %s570_s20, 0 }
  0x1b   : > { %s555_s11 = scalar_select %p554_p13, %s1927_s13, 0  ;;  %v603_v1 = vld [vmem:[%s548_s29] sm:$0xff] }
  0x1c   : > { %v605_v3 = vmul.f32 %v604_v2, %v603_v1  ;;  %s1738_s25 = scalar_select %p849_p4, 0, 1 }
  0x1d   : > { %s2227_s11 = smov (!%p1715_p8, %s555_s11), 7  ;;  %p1099_p7 = scmp.lt.s32.totalorder %s570_s20, 8 }
  0x1e   : > { %p560_p2 = scmp.lt.s32.totalorder %s2227_s11, 7  ;;  %607 = vrot.lane.b32.xlu0 %v605_v3, %s1947_s21  ;;  %s852_s28 = scvt.s32.f32 %s1738_s25 }
  0x1f   : > { %s572_s24 = scalar_select %p571_p3, %s570_s20, 0 }
  0x20   : > { %s2229_s11 = smov (!%p560_p2, %s2227_s11), 7  ;;  %v854_v5 = vstv %s852_s28  ;;  %p1100_p8 = pnand %p1099_p7, %p1098_p6 }
  0x21   : > { %s563_s26 = sadd.s32 %s2042_s22, %s2229_s11  ;;  %s2231_s24 = smov (!%p1722_p5, %s572_s24), 7 }
  0x22   : > { %s1721_s27 = sshll.u32 %s563_s26, 3  ;;  %p577_p9 = scmp.lt.s32.totalorder %s2231_s24, 7 }
  0x23   : > { %s565_s12 = scalar_lea.vmem %s2196_s2, %s1721_s27 }
  0x24   : > { %v853_v4 = vld [vmem:[%s565_s12] sm:$0xff]  ;;  %s1746_s1 = scalar_select %p1100_p8, 0, 1 }
  0x25   : > { %v855_v6 = vmul.f32 %v854_v5, %v853_v4  ;;  %s2233_s24 = smov (!%p577_p9, %s2231_s24), 7 }
  0x26   : > { %s1103_s11 = scvt.s32.f32 %s1746_s1  ;;  %s580_s26 = sadd.s32 %s2042_s22, %s2233_s24 }
  0x27   : > { %857 = vrot.lane.b32.xlu0 %v855_v6, %s1947_s21  ;;  %s1728_s25 = sshll.u32 %s580_s26, 3  ;;  %s1948_s1 = smov 126  }
  0x28   : > { %v1105_v7 = vstv %s1103_s11  ;;  %s582_s27 = scalar_lea.vmem %s2197_s3, %s1728_s25  ;;  %s1705_s25 = sshll.u32 %s1927_s13, 1 }
  0x29   : > { %v1104_v8 = vld [vmem:[%s582_s27] sm:$0xff]  ;;  %s525_s20 = sadd.s32 1, %s1705_s25  ;;  %s1854_s24 = smul.u32 18, %s2221_s14 }
  0x2a   : > { %v1106_v9 = vmul.f32 %v1105_v7, %v1104_v8  ;;  %p528_p10 = scmp.lt.s32.totalorder %s525_s20, 17  ;;  %v1441_v7 = vld [vmem:[%s2202_s8] sm:$0xff] }
  0x2c   : > { %1108 = vrot.lane.b32.xlu1 %v1106_v9, %s1947_s21  ;;  %s2235_s20 = smov (!%p528_p10, %s525_s20), 17 }
  0x2d   : > { %s531_s14 = sadd.s32 %s1854_s24, %s2235_s20 }
  0x2e   : > { %s1706_s26 = sshll.u32 %s531_s14, 2  ;;  %s2208_s14 = sadd.s32 %s2042_s22, %s2048_s23 }
  0x2f   : > { %s533_s27 = scalar_lea.vmem %s2194_s0, %s1706_s26  ;;  %s1730_s26 = sshll.u32 %s2208_s14, 3 }
  0x30   : > { %v1356_v37 = vld [vmem:[%s533_s27] sm:$0xf]  ;;  %s595_s27 = scalar_lea.vmem %s2204_s10, %s1730_s26 }
  0x90   : > { %v608_v10 = vpop.permute.xlu0 %607 }
  0x91   : > { %v611_v11 = vsel %vm610_vm1, 0.0, %v608_v10 }
  0x92   : > { %v613_v13 = vsel %vm612_vm2, %v611_v11, 0.0  ;;  %1805 = vmatpush3.msk.msra.mxu1 %vm612_vm2, %v611_v11 }
  0x93   : > { %770 = vrot.lane.b32.xlu0 %v613_v13, %s1948_s1  ;;  %618 = vrot.lane.b32.xlu1 %v613_v13, %s1949_s19 }
  0x94   : > { %1814 = vmatprep.subr.mxu1 %v1945_v0  ;;  %1807 = vmatmul.mubr.msk.f32.vlgmr.msra.gmra.mrb[0].mxu1 %vm621_vm3, %v614_v12 }
  0x95   : > { %1816 = vmatprep.mubr.msk.f32.mxu1 %vm1946_vm0, %v1945_v0 }
  0x99   : > { %v858_v14 = vpop.permute.xlu0 %857 }
  0x9a   : > { %v860_v15 = vsel %vm610_vm1, 0.0, %v858_v14 }
  0x9b   : > { %v861_v17 = vsel %vm612_vm2, %v860_v15, 0.0  ;;  %1815 = vmatpush3.msk.msra.mxu1 %vm612_vm2, %v860_v15 }
  0x9c   : > { %941 = vrot.lane.b32.xlu1 %v861_v17, %s1949_s19  ;;  %1020 = vrot.lane.b32.xlu0 %v861_v17, %s1948_s1 }
  0x9d   : > { %1817 = vmatmul.mubr.msk.f32.vlgmr.msra.gmra.mrb[2].mxu1 %vm621_vm3, %v1739_v16  ;;  %1824 = vmatprep.subr.mxu1 %v1945_v0 }
  0x9e   : > { %1826 = vmatprep.mubr.msk.f32.mxu1 %vm1946_vm0, %v1945_v0  ;;  %v1109_v19 = vpop.permute.xlu1 %1108 }
  0x9f   : > { %v1111_v20 = vsel %vm610_vm1, 0.0, %v1109_v19 }
  0xa0   : > { %v1112_v21 = vsel %vm612_vm2, %v1111_v20, 0.0 }
  0xa1   : > { %1192 = vrot.lane.b32.xlu1 %v1112_v21, %s1949_s19  ;;  %1271 = vrot.lane.b32.xlu0 %v1112_v21, %s1948_s1 }
  0xa5   : > { %1351 = vperm.xlu1 %1901, %v1348_v22   ;;  %1446 = vperm.xlu0 %1902, %v1443_v43  }
  0xa9   : > { %1360 = vperm.xlu1 %1901, %v1357_v23  }
 0x105   : > { %v619_v25 = vpop.permute.xlu1 %618  ;;  %v771_v26 = vpop.permute.xlu0 %770 }
 0x106   : > { %1800 = vmatpush3.msra.mxu0 %v619_v25 }
 0x107   : > { %1802 = vmatmul.mubr.msk.f32.vlgmr.msra.gmra.mrb[0].mxu0 %vm621_vm3, %v1732_v24  ;;  %1809 = vmatprep.subr.mxu0 %v1945_v0 }
 0x108   : > { %1810 = vmatpush3.msra.mxu0 %v771_v26  ;;  %1811 = vmatprep.mubr.msk.f32.mxu0 %vm1946_vm0, %v1945_v0 }
 0x109   : > { %1819 = vmatprep.subr.mxu0 %v1945_v0 }
 0x10b   : > { %1812 = vmatmul.mubr.msk.f32.vlgmr.msra.gmra.mrb[2].mxu0 %vm621_vm3, %v1736_v27 }
 0x10c   : > { %1821 = vmatprep.mubr.msk.f32.mxu0 %vm1946_vm0, %v1945_v0 }
 0x10e   : > { %v942_v29 = vpop.permute.xlu1 %941  ;;  %v1021_v30 = vpop.permute.xlu0 %1020 }
 0x10f   : > { %1820 = vmatpush3.msra.mxu0 %v942_v29  ;;  %1825 = vmatpush3.msra.mxu1 %v1021_v30 }
 0x110   : > { %1829 = vmatprep.subr.mxu0 %v1945_v0  ;;  %1822 = vmatmul.mubr.msk.f32.vlgmr.msra.gmra.mrb[4].mxu0 %vm621_vm3, %v1742_v28 }
 0x111   : > { %1830 = vmatpush3.msk.msra.mxu0 %vm612_vm2, %v1111_v20  ;;  %1827 = vmatmul.mubr.msk.f32.vlgmr.msra.gmra.mrb[4].mxu1 %vm621_vm3, %v1744_v31 }
 0x112   : > { %1831 = vmatprep.mubr.msk.f32.mxu0 %vm1946_vm0, %v1945_v0  ;;  %1834 = vmatprep.subr.mxu1 %v1945_v0 }
 0x113   : > { %1836 = vmatprep.mubr.msk.f32.mxu1 %vm1946_vm0, %v1945_v0  ;;  %1839 = vmatprep.subr.mxu0 %v1945_v0  ;;  %v1193_v35 = vpop.permute.xlu1 %1192  ;;  %v1272_v36 = vpop.permute.xlu0 %1271 }
 0x114   : > { %1832 = vmatmul.mubr.msk.f32.vlgmr.msra.gmra.mrb[6].mxu0 %vm621_vm3, %v1747_v32  ;;  %1835 = vmatpush3.msra.mxu1 %v1193_v35 }
 0x115   : > { %1841 = vmatprep.mubr.msk.f32.mxu0 %vm1946_vm0, %v1945_v0  ;;  %1840 = vmatpush3.msra.mxu0 %v1272_v36 }
 0x116   : > { %1837 = vmatmul.mubr.msk.f32.vlgmr.msra.gmra.mrb[6].mxu1 %vm621_vm3, %v1750_v33  ;;  %1844 = vmatprep.subr.mxu1 %v1945_v0 }
 0x117   : > { %1846 = vmatprep.mubr.msk.f32.mxu1 %vm1946_vm0, %v1945_v0  ;;  %1845 = vmatpush3.msk.msra.mxu1 %vm1367_vm4, %v1356_v37 }
 0x118   : > { %1842 = vmatmul.mubr.msk.f32.vlgmr.msra.gmra.mrb[8].mxu0 %vm621_vm3, %v1752_v34  ;;  %1849 = vmatprep.subr.mxu0 %v1945_v0 }
 0x119   : > { %1851 = vmatprep.mubr.msk.f32.mxu0 %vm1946_vm0, %v1945_v0 }
 0x11a   : > { %1847 = vmatmul.mubr.msk.f32.vlgmr.msra.gmra.mrb[8].mxu1 %vm1363_vm5, %v1355_v38 }
 0x124   : > { %v1352_v2 = vpop.permute.xlu1 %1351  ;;  %v1447_v8 = vpop.permute.xlu0 %1446 }
 0x128   : > { %v1361_v12 = vpop.permute.xlu1 %1360 }
 0x167   : > { %v764_v39 = vpop.f32.mrb[0].mxu1 }
 0x168   : > { %v1808_v40 = vpop.f32.mrb[1].mxu1 }
 0x170   : > { %v933_v41 = vpop.f32.mrb[2].mxu1 }
 0x171   : > { %v1818_v42 = vpop.f32.mrb[3].mxu1 }
 0x1da   : > { %v691_v44 = vpop.f32.mrb[0].mxu0 }
 0x1db   : > { %v765_v45 = vadd.f32 %v764_v39, %v691_v44  ;;  %v1803_v46 = vpop.f32.mrb[1].mxu0 }
 0x1de   : > { %v842_v47 = vpop.f32.mrb[2].mxu0 }
 0x1df   : > { %v846_v48 = vadd.f32 %v842_v47, %v765_v45  ;;  %v1813_v49 = vpop.f32.mrb[3].mxu0 }
 0x1e1   : > { %v937_v50 = vadd.f32 %v933_v41, %v846_v48 }
 0x1e3   : > { %v1013_v51 = vpop.f32.mrb[4].mxu0 }
 0x1e4   : > { %v1017_v52 = vadd.f32 %v1013_v51, %v937_v50  ;;  %v1823_v53 = vpop.f32.mrb[5].mxu0  ;;  %v1092_v54 = vpop.f32.mrb[4].mxu1 }
 0x1e5   : > { %v1828_v55 = vpop.f32.mrb[5].mxu1 }
 0x1e6   : > { %v1096_v56 = vadd.f32 %v1092_v54, %v1017_v52 }
 0x1e7   : > { %v1184_v57 = vpop.f32.mrb[6].mxu0 }
 0x1e8   : > { %v1188_v58 = vadd.f32 %v1184_v57, %v1096_v56  ;;  %v1833_v59 = vpop.f32.mrb[7].mxu0 }
 0x1e9   : > { %v1264_v60 = vpop.f32.mrb[6].mxu1 }
 0x1ea   : > { %v1268_v62 = vadd.f32 %v1264_v60, %v1188_v58  ;;  %v1838_v63 = vpop.f32.mrb[7].mxu1 }
 0x1eb   : > { %v1343_v61 = vpop.f32.mrb[8].mxu0 }
 0x1ec   : > { %v1843_v0 = vpop.f32.mrb[9].mxu0  ;;  %v1347_v1 = vadd.f32 %v1343_v61, %v1268_v62 }
 0x1ed   : > { %v1437_v3 = vpop.f32.mrb[8].mxu1 }
 0x1ee   : > { %v1354_v4 = vadd.f32 %v1352_v2, %v1347_v1  ;;  %v1848_v5 = vpop.f32.mrb[9].mxu1  ;;  %v1438_v14 = vadd.f32 %v1437_v3, %v1361_v12 }
 0x1f0   : > { %v1442_v6 = vmul.f32 %v1354_v4, %v1354_v4 }
 0x1f2   : > { %1850 = vmatpush3.msra.mxu0 %v1442_v6 }
 0x1f3   : > { %1852 = vmatmul.mubr.msk.f32.vlgmr.msra.gmra.mrb[10].mxu0 %vm621_vm3, %v1441_v7 }
 0x2c6   : > { %v1518_v9 = vpop.f32.mrb[10].mxu0 }
 0x2c7   : > { %v1519_v10 = vadd.f32 %v1518_v9, %v1447_v8  ;;  %v1853_v11 = vpop.f32.mrb[11].mxu0 }
 0x2c9   : > { %1903 = vrsqrt.f32 %v1519_v10 }
 0x2d3   : > { %v1904_v13 = vpop.eup %1903 }
 0x2d4   : > { %v1523_v15 = vmul.f32 %v1904_v13, %v1354_v4 }
 0x2d6   : > { %v1524_v16 = vadd.f32 %v1523_v15, %v1438_v14 }
 0x2d8   : > { %1525 = vst.msk [vmem:[%s595_s27] sm:$0xff] %vm621_vm3, %v1524_v16 }
 0x2d9 PF: > { %s20_s17 = sadd.s32 1, %s1943_s17   ;;  %s2209_s20 = sld [smem:[#allocation2_spill]] }
 0x2da   : > { %p17_p11 = scmp.ge.s32.totalorder %s20_s17, 18   ;;  %s2210_s13 = smov %s1935_s15 }
 0x2db   : > { %s2211_s14 = smov %s1939_s16  ;;  %s2212_s15 = smov %s2215_s18 }
 0x2dc   :  { %19 = sbr.rel (!%p17_p11) target bundleno = 3 (0x3), region = 107 }
 0x2df   : > { %s2213_s16 = smov %s2209_s20 }

</bundles_post_ra>
